<compile_context>
chip_gen: v6e
topology: v6e:2x2x1
jax: 0.10.0
libtpu: 0.0.40
codegen_flags: <defaults>
</compile_context>

<pallas_src>
import functools
import math

import numpy as np
import jax
import jax.numpy as jnp
from jax.experimental import pallas as pl
from jax.experimental.pallas import tpu as pltpu

V_THRESHOLD = 1.0  # spikingjelly IFNode default


# ----------------------------------------------------------------------------------------
# Generation-aware block budget
# ----------------------------------------------------------------------------------------
_BUDGET_CACHE = None


def _budget():
    """(max_block_elems, vmem_limit_bytes) sized from this chip's physical VMEM."""
    global _BUDGET_CACHE
    if _BUDGET_CACHE is None:
        vmem_bytes = 64 * 1024 * 1024  # conservative default (v7x per-core VMEM)
        try:
            info = pltpu.get_tpu_info()
            vmem_bytes = int(getattr(info, "vmem_capacity_bytes", vmem_bytes))
        except Exception:
            pass
        # Live pipeline footprint ~= 8 f32 block-sized buffers (double-buffered x / out,
        # v_in, plus the resident v accumulator).  Keep it around 40% of physical VMEM:
        # big blocks on v5e/v6e (128 MiB), capped on v7x (64 MiB).
        footprint = (vmem_bytes * 2) // 5
        max_block_elems = max(8 * 128, footprint // (8 * 4))
        max_block_elems = min(max_block_elems, 2 * 1024 * 1024)
        vmem_limit = min(vmem_bytes - (4 << 20), footprint + (16 << 20))
        vmem_limit = max(vmem_limit, 32 << 20)
        _BUDGET_CACHE = (int(max_block_elems), int(vmem_limit))
    return _BUDGET_CACHE


def _plan_tiling(total, max_block_elems):
    """Pick (lanes, rows, row_tile, grid_rows, pad) for a flattened elementwise slab."""
    lanes = None
    for c in (1024, 512, 256, 128):          # lane-dense last dim, prefer no padding
        if total % c == 0:
            lanes = c
            break
    if lanes is None:
        lanes = 128                          # rare fallback: pad flat tail up to 128
    rows = -(-total // lanes)
    pad = rows * lanes - total
    tm_cap = max(8, ((max_block_elems // lanes) // 8) * 8)
    if rows <= tm_cap:
        tm = rows                            # full dim -> always a legal block shape
        if rows >= 16:
            # keep >= 2 row blocks so ("parallel", ...) can split across v7x's 2 TCs
            tm = ((-(-rows // 2) + 7) // 8) * 8
    else:
        tm = tm_cap                          # multiple of 8; ragged last block is fine
    grid_rows = -(-rows // tm)
    return lanes, rows, tm, grid_rows, pad


# ----------------------------------------------------------------------------------------
# Kernels
# ----------------------------------------------------------------------------------------
def _if_step(x_ref, v_ref, out_ref, scale, v_threshold):
    """One IF step: charge with x/scale, fire, soft reset. v_ref is the resident state."""
    v = v_ref[...] + x_ref[...].astype(jnp.float32) / scale
    spike = (v >= v_threshold).astype(jnp.float32)
    v_ref[...] = v - spike * v_threshold
    out_ref[...] = (spike * scale).astype(out_ref.dtype)


def _fused_first_kernel(x_ref, out_ref, v_ref, *, scale, shift, v_threshold):
    """Sequence starting at module-t==0: pre-charge with `shift` (constant, folded in f32)."""
    t = pl.program_id(1)

    @pl.when(t == 0)
    def _():
        shift_f = np.float32(shift)
        thr_f = np.float32(v_threshold)
        spike0 = np.float32(1.0) if shift_f >= thr_f else np.float32(0.0)
        v_init = np.float32(shift_f - spike0 * thr_f)
        v_ref[...] = jnp.full(v_ref.shape, v_init, dtype=jnp.float32)

    _if_step(x_ref, v_ref, out_ref, scale, v_threshold)


def _fused_cont_kernel(x_ref, v_in_ref, out_ref, v_ref, *, scale, v_threshold):
    """Sequence continuing from an existing membrane state (module-t > 0)."""
    t = pl.program_id(1)

    @pl.when(t == 0)
    def _():
        v_ref[...] = v_in_ref[...]

    _if_step(x_ref, v_ref, out_ref, scale, v_threshold)


# ----------------------------------------------------------------------------------------
# Fused multi-timestep entry point
# ----------------------------------------------------------------------------------------
def _fused_pallas(xs, v_prev, *, scale, shift, first):
    T = xs.shape[0]
    total = math.prod(xs.shape[1:])
    max_block_elems, vmem_limit = _budget()
    lanes, rows, tm, grid_rows, pad = _plan_tiling(total, max_block_elems)

    flat = xs.reshape(T, total)                      # contiguous reshape: no HBM pass
    if pad:
        # TODO(synk): extra pad pass only triggers when numel % 128 != 0.
        flat = jnp.pad(flat, ((0, 0), (0, pad)))
    x3 = flat.reshape(T, rows, lanes)

    x_spec = pl.BlockSpec((None, tm, lanes), lambda i, t: (t, i, 0))
    o_spec = pl.BlockSpec((None, tm, lanes), lambda i, t: (t, i, 0))
    v_spec = pl.BlockSpec((tm, lanes), lambda i, t: (i, 0))   # revisited across t -> resident

    out_shape = (jax.ShapeDtypeStruct((T, rows, lanes), xs.dtype),
                 jax.ShapeDtypeStruct((rows, lanes), jnp.float32))
    cparams = pltpu.CompilerParams(
        dimension_semantics=("parallel", "arbitrary"),
        vmem_limit_bytes=vmem_limit)

    if first:
        out3, v_new = pl.pallas_call(
            functools.partial(_fused_first_kernel, scale=scale, shift=shift,
                              v_threshold=V_THRESHOLD),
            out_shape=out_shape,
            grid_spec=pltpu.PrefetchScalarGridSpec(
                num_scalar_prefetch=0,
                grid=(grid_rows, T),
                in_specs=[x_spec],
                out_specs=(o_spec, v_spec)),
            compiler_params=cparams,
        )(x3)
    else:
        out3, v_new = pl.pallas_call(
            functools.partial(_fused_cont_kernel, scale=scale,
                              v_threshold=V_THRESHOLD),
            out_shape=out_shape,
            grid_spec=pltpu.PrefetchScalarGridSpec(
                num_scalar_prefetch=0,
                grid=(grid_rows, T),
                in_specs=[x_spec, v_spec],
                out_specs=(o_spec, v_spec)),
            input_output_aliases={1: 1},             # update membrane slab in place
            compiler_params=cparams,
        )(x3, v_prev)

    out = out3.reshape(T, rows * lanes)
    if pad:
        out = out[:, :total]
    return out.reshape(xs.shape), v_new


@functools.partial(jax.jit, static_argnames=("scale", "shift"))
def _fused_first_call(xs, *, scale, shift):
    return _fused_pallas(xs, None, scale=scale, shift=shift, first=True)


@functools.partial(jax.jit, static_argnames=("scale",), donate_argnums=(1,))
def _fused_cont_call(xs, v_prev, *, scale):
    return _fused_pallas(xs, v_prev, scale=scale, shift=0.0, first=False)


# ----------------------------------------------------------------------------------------
# Module wrapper
# ----------------------------------------------------------------------------------------
class ScaledNeuron:
    """Stateful JAX/Pallas port of the PyTorch ScaledNeuron module."""

    def __init__(self, scale=1.0, shift=0.5):
        self.scale = float(scale)
        self.shift = float(shift)
        self.t = 0
        self._v = None  # (rows, lanes) f32 membrane-potential slab

    def reset(self):
        self.t = 0
        self._v = None

    def membrane(self, shape):
        """Membrane potential in the original tensor shape (padding dropped)."""
        total = math.prod(shape)
        return self._v.reshape(-1)[:total].reshape(shape)

    def _run(self, xs):
        if self.t == 0 or self._v is None:
            out, self._v = _fused_first_call(xs, scale=self.scale, shift=self.shift)
        else:
            out, self._v = _fused_cont_call(xs, self._v, scale=self.scale)
        self.t += xs.shape[0]
        return out

    def __call__(self, x):
        """One timestep — same semantics as the PyTorch forward()."""
        return self._run(x[None])[0]

    def forward_sequence(self, xs):
        """Fused path: xs has a leading T axis; all T IF steps run in one pallas_call."""
        return self._run(xs)


# ----------------------------------------------------------------------------------------
# Pure-JAX reference + demo
# ----------------------------------------------------------------------------------------
def _reference_step(x, v, scale, shift, first_step):
    x = x.astype(jnp.float32)
    if first_step:
        v = v + shift
        s0 = (v >= V_THRESHOLD).astype(jnp.float32)
        v = v - s0 * V_THRESHOLD
    v = v + x / scale
    s = (v >= V_THRESHOLD).astype(jnp.float32)
    v = v - s * V_THRESHOLD
    return s * scale, v


if __name__ == "__main__":
    key = jax.random.PRNGKey(0)
    N, C, H, W = 2, 4, 16, 16           # NCHW per-timestep shape
    T = 4
    scale, shift = 1.0, 0.5
    xs = jax.random.normal(key, (T, N, C, H, W), dtype=jnp.float32) * 1.5

    # Fused path: all T timesteps in one pallas_call (v never round-trips HBM mid-sequence).
    neuron = ScaledNeuron(scale=scale, shift=shift)
    ys_fused = neuron.forward_sequence(xs)
    jax.block_until_ready(ys_fused)

    # Per-step path (PyTorch-equivalent call-per-timestep API).
    neuron_step = ScaledNeuron(scale=scale, shift=shift)
    ys_step = jnp.stack([neuron_step(xs[t]) for t in range(T)])
    jax.block_until_ready(ys_step)

    # Pure-JAX reference.
    v_ref = jnp.zeros((N, C, H, W), jnp.float32)
    refs = []
    for t in range(T):
        r, v_ref = _reference_step(xs[t], v_ref, scale, shift, first_step=(t == 0))
        refs.append(r)
    refs = jnp.stack(refs)

    assert jnp.allclose(ys_fused, refs, atol=1e-6), "fused-sequence output mismatch"
    assert jnp.allclose(ys_step, refs, atol=1e-6), "per-step output mismatch"
    assert jnp.allclose(neuron.membrane((N, C, H, W)), v_ref, atol=1e-6), "fused state mismatch"
    assert jnp.allclose(neuron_step.membrane((N, C, H, W)), v_ref, atol=1e-6), "step state mismatch"

    print("KERNEL_OK")
</pallas_src>

<mosaic_0001>
module attributes {stable_mosaic.version = 11 : i64} {
  func.func @_fused_first_kernel(%arg0: i32, %arg1: i32, %arg2: memref<1x2x1024xf32, #tpu.memory_space<vmem>>, %arg3: memref<1x2x1024xf32, #tpu.memory_space<vmem>>, %arg4: memref<2x1024xf32, #tpu.memory_space<vmem>>) attributes {dimension_semantics = [#tpu.dimension_semantics<parallel>, #tpu.dimension_semantics<arbitrary>], iteration_bounds = array<i64: 1, 4>, scalar_prefetch = 0 : i64, scratch_operands = 0 : i64, tpu.core_type = #tpu.core_type<tc>, window_params = [{transform_indices = @transform_0, window_bounds = array<i64: 1, 2, 1024>}, {transform_indices = @transform_1, window_bounds = array<i64: 1, 2, 1024>}, {transform_indices = @transform_2, window_bounds = array<i64: 2, 1024>}]} {
    %c0_i32 = arith.constant 0 : i32
    %0 = arith.cmpi eq, %arg1, %c0_i32 : i32
    %1 = arith.extui %0 : i1 to i32
    %c0_i32_0 = arith.constant 0 : i32
    %2 = arith.cmpi ne, %1, %c0_i32_0 : i32
    scf.if %2 {
      %cst_13 = arith.constant 5.000000e-01 : f32
      %22 = vector.broadcast %cst_13 : f32 to vector<2x1024xf32>
      %c0_14 = arith.constant 0 : index
      %c0_15 = arith.constant 0 : index
      %23 = vector.load %arg4[%c0_14, %c0_15] : memref<2x1024xf32, #tpu.memory_space<vmem>>, vector<2x1024xf32>
      tpu.vector_store %arg4[%c0_14, %c0_15], %22 {strides = array<i32>} : memref<2x1024xf32, #tpu.memory_space<vmem>>, vector<2x1024xf32>,
    } else {
    }
    %c0 = arith.constant 0 : index
    %c0_1 = arith.constant 0 : index
    %3 = vector.load %arg4[%c0, %c0_1] : memref<2x1024xf32, #tpu.memory_space<vmem>>, vector<2x1024xf32>
    %c0_2 = arith.constant 0 : index
    %c0_3 = arith.constant 0 : index
    %c0_4 = arith.constant 0 : index
    %4 = vector.load %arg2[%c0_2, %c0_3, %c0_4] : memref<1x2x1024xf32, #tpu.memory_space<vmem>>, vector<1x2x1024xf32>
    %5 = vector.shape_cast %4 : vector<1x2x1024xf32> to vector<2x1024xf32>
    %cst = arith.constant 1.000000e+00 : f32
    %6 = vector.broadcast %cst : f32 to vector<2x1024xf32>
    %7 = arith.divf %5, %6 : vector<2x1024xf32>
    %8 = arith.addf %3, %7 : vector<2x1024xf32>
    %cst_5 = arith.constant 1.000000e+00 : f32
    %9 = vector.broadcast %cst_5 : f32 to vector<2x1024xf32>
    %10 = arith.cmpf oge, %8, %9 : vector<2x1024xf32>
    %11 = arith.extui %10 : vector<2x1024xi1> to vector<2x1024xi32>
    %12 = arith.sitofp %11 : vector<2x1024xi32> to vector<2x1024xf32>
    %cst_6 = arith.constant 1.000000e+00 : f32
    %13 = vector.broadcast %cst_6 : f32 to vector<2x1024xf32>
    %14 = arith.mulf %12, %13 : vector<2x1024xf32>
    %15 = arith.subf %8, %14 : vector<2x1024xf32>
    %c0_7 = arith.constant 0 : index
    %c0_8 = arith.constant 0 : index
    %16 = vector.load %arg4[%c0_7, %c0_8] : memref<2x1024xf32, #tpu.memory_space<vmem>>, vector<2x1024xf32>
    tpu.vector_store %arg4[%c0_7, %c0_8], %15 {strides = array<i32>} : memref<2x1024xf32, #tpu.memory_space<vmem>>, vector<2x1024xf32>,
    %cst_9 = arith.constant 1.000000e+00 : f32
    %17 = vector.broadcast %cst_9 : f32 to vector<2x1024xf32>
    %18 = arith.mulf %12, %17 : vector<2x1024xf32>
    %c0_10 = arith.constant 0 : index
    %c0_11 = arith.constant 0 : index
    %c0_12 = arith.constant 0 : index
    %19 = vector.load %arg3[%c0_10, %c0_11, %c0_12] : memref<1x2x1024xf32, #tpu.memory_space<vmem>>, vector<1x2x1024xf32>
    %20 = vector.shape_cast %19 : vector<1x2x1024xf32> to vector<2x1024xf32>
    %21 = vector.shape_cast %18 : vector<2x1024xf32> to vector<1x2x1024xf32>
    tpu.vector_store %arg3[%c0_10, %c0_11, %c0_12], %21 {strides = array<i32>} : memref<1x2x1024xf32, #tpu.memory_space<vmem>>, vector<1x2x1024xf32>,
    return
  }
  func.func @transform_0(%arg0: i32, %arg1: i32) -> (i32, i32, i32) {
    %c0_i32 = arith.constant 0 : i32
    %c0_i32_0 = arith.constant 0 : i32
    return %arg1, %arg0, %c0_i32 : i32, i32, i32
  }
  func.func @transform_1(%arg0: i32, %arg1: i32) -> (i32, i32, i32) {
    %c0_i32 = arith.constant 0 : i32
    %c0_i32_0 = arith.constant 0 : i32
    return %arg1, %arg0, %c0_i32 : i32, i32, i32
  }
  func.func @transform_2(%arg0: i32, %arg1: i32) -> (i32, i32) {
    %c0_i32 = arith.constant 0 : i32
    %c0_i32_0 = arith.constant 0 : i32
    return %arg0, %c0_i32 : i32, i32
  }
}

</mosaic_0001>

<bundles_post_ra>
// kernel: _fused_first_call.1
= control target key start
LH: loop header
LB: loop body
LE: loop exit
PB: predicated region body
PF: predicated region fallthrough
CT: control target
= control target key end

     0   :  { %8 = vsyncpa [#allocation3], 0  ;;  %s451_s9 = smov 0   ;;  %s453_s10 = smov 0   ;;  %s502_s0 = inlined_call_operand.vmem [shape: f32[4,2,1024], index: 0, kind: input, shape index: {}]   ;;  %s503_s1 = inlined_call_operand.vmem [shape: f32[4,2,1024], index: 1, kind: output, shape index: {0}]   ;;  %s504_s2 = inlined_call_operand.hbm [shape: f32[2,1024], index: 2, kind: output, shape index: {1}]  }
   0x1   :  { %s455_s11 = smov 0  }
   0x2 LB: > { %s330_s12 = sadd.s32 4294967295, %s431_s11   ;;  %s23_s13 = sadd.s32 1, %s427_s10  ;;  %s431_s11 = sphi %s455_s11, %s14_s11   ;;  %s427_s10 = sphi %s453_s10, %s507_s10   ;;  %s423_s9 = sphi %s451_s9, %s506_s9  }
   0x3   : > { %p24_p0 = scmp.ge.s32.totalorder %s23_s13, 4  ;;  %p334_p1 = scmp.ge.s32.totalorder %s431_s11, 1 }
   0x4   : > { %p136_p2 = scmp.lt.s32.totalorder %s431_s11, 5 }
   0x5   : > { %s509_s13 = smov (%p24_p0, %s23_s13), 0 }
   0x6   : > { %p137_p3 = pnand %p334_p1, %p136_p2 }
   0x7   : > { %p166_p4 = scmp.lt.s32.totalorder (!%p137_p3), %s423_s9, 3  ;;  %p339_p5 = scmp.ne.s32.totalorder (!%p137_p3), %s423_s9, 0 }
   0x8   : > { %140 = sbr.rel (%p137_p3) target bundleno = 39 (0x27), region = 24 }
   0xd   : > { %s167_s14 = scalar_select %p166_p4, %s423_s9, 3 }
   0xe   : > { %187 = sbr.rel (%p339_p5) target bundleno = 21 (0x15), region = 28 }
   0xf   : > { %s346_s15 = sshll.u32 %s167_s14, 4 }
  0x10   : > { %s174_s18 = scalar_lea.vmem %s502_s0, %s346_s15  ;;  %s183_s21 = scalar_lea.vmem %s503_s1, %s346_s15 }
  0x13   : > { %v433_v0 = vmov 0.5  }
  0x14   : > { %188 = vst [vmem:[#allocation2] sm:$0xff] %v433_v0  ;;  %189 = vst [vmem:[#allocation2 + $0x8] sm:$0xff] %v433_v0 }
  0x15 PF: > { %v192_v2 = vld [vmem:[%s174_s18] sm:$0xff]  ;;  %v193_v5 = vld [vmem:[%s174_s18 + $0x8] sm:$0xff]  ;;  %s434_s22 = smov [#allocation2]   ;;  %v435_v7 = vmov 0.0   ;;  %p478_p6 = scmp.eq.s32.totalorder %s330_s12, 3 }
  0x16   : > { %s230_s23 = sshll.u32 %s434_s22, 4  ;;  %s231_s23 = int_to_ptr.vmem [resolvable:$true] %s230_s23 }
  0x17   : > { %s381_s25 = scalar_lea.vmem %s231_s23, 256  ;;  %p388_p10 = scmp.lt.s32.totalorder %s231_s23, %s231_s23 }
  0x18   : > { %p382_p7 = scmp.ne.s32.totalorder %s231_s23, %s381_s25  ;;  %p389_p11 = scmp.lt.s32.totalorder %s381_s25, %s381_s25 }
  0x1a   : > { %p383_p8 = pnand %p382_p7, %p478_p6  ;;  %p390_p12 = por %p389_p11, %p388_p10 }
  0x1b   : > { %v190_v1 = vld [vmem:[#allocation2] sm:$0xff]  ;;  %v191_v3 = vld [vmem:[#allocation2 + $0x8] sm:$0xff] }
  0x1c   : > { %v194_v4 = vadd.f32 %v192_v2, %v190_v1  ;;  %v195_v6 = vadd.f32 %v193_v5, %v191_v3  ;;  %p384_p9 = pneg %p383_p8 }
  0x1e   : > { %vm196_vm0 = vcmp.ge.f32.partialorder %v194_v4, 1.0  ;;  %vm197_vm1 = vcmp.ge.f32.partialorder %v195_v6, 1.0  ;;  %p391_p13 = pnand %p390_p12, %p384_p9 }
  0x1f   : > { %v340_v8 = vsel %vm196_vm0, 1.0, %v435_v7  ;;  %v341_v10 = vsel %vm197_vm1, 1.0, %v435_v7 }
  0x20   : > { %v202_v9 = vsub.f32 %v194_v4, %v340_v8  ;;  %206 = vst [vmem:[%s183_s21] sm:$0xff] %v340_v8  ;;  %v203_v11 = vsub.f32 %v195_v6, %v341_v10  ;;  %207 = vst [vmem:[%s183_s21 + $0x8] sm:$0xff] %v341_v10 }
  0x22   : > { %204 = vst [vmem:[#allocation2] sm:$0xff] %v202_v9  ;;  %205 = vst [vmem:[#allocation2 + $0x8] sm:$0xff] %v203_v11 }
  0x23   : > { %394 = shalt.err (!%p391_p13)
}
  0x24   : > { %349 = dma.vmem_to_hbm [thread:$0]  (%p478_p6), %s231_s23, 256, %s504_s2, [#allocation3]  }
  0x25   : > { %418 = dma.done.wait (%p478_p6), [#allocation3], 256  }
  0x26   : > { %420 = vsyncadd (%p478_p6), [#allocation3], 4294967040 }
  0x27 PF: > { %s14_s11 = sadd.s32 1, %s431_s11   ;;  %s506_s9 = smov %s427_s10 }
  0x28   : > { %p11_p0 = scmp.ge.s32.totalorder %s14_s11, 6   ;;  %s507_s10 = smov %s509_s13 }
  0x2a   :  { %13 = sbr.rel (!%p11_p0) target bundleno = 2 (0x2), region = 68 }
  0x2f   :  { %255 = vsyncpa [#allocation3], 1 }
  0x30   :  { %257 = vsyncpa [#allocation3 + $0x1], 1 }

</bundles_post_ra>
